<compile_context>
chip_gen: v7x
topology: tpu7x:2x2x1
jax: 0.10.0
libtpu: 0.0.40
codegen_flags: <defaults>
</compile_context>

<pallas_src>
import functools
import random

import jax
import jax.numpy as jnp
from jax.experimental import pallas as pl
from jax.experimental.pallas import tpu as pltpu

MAX_VALUE = 1024.0
_LANE_CAP = 4096          # max lane (last-dim) width of flattened 2-D views


# ------------------------- chip detection & budgets --------------------------

def _is_big_vmem_chip():
    """True on v4/v5/v6-class chips (128 MiB VMEM, single TensorCore)."""
    kind = ""
    try:
        kind = jax.devices()[0].device_kind.lower()
    except Exception:
        pass
    if ("v4" in kind) or ("v5" in kind) or ("v6" in kind):
        return True
    if "7" in kind:
        return False
    # fall back to a hardware query; stay conservative (small VMEM) otherwise
    try:
        get_info = getattr(pltpu, "get_tpu_info", None)
        if get_info is not None:
            info = get_info()
            for attr in ("vmem_capacity_bytes", "vmem_size_bytes", "vmem_bytes"):
                v = getattr(info, attr, None)
                if v:
                    return int(v) > 64 * 1024 * 1024
    except Exception:
        pass
    return False


if _is_big_vmem_chip():                    # v5e / v6e (/ v4, v5p): 128 MiB VMEM
    _BLOCK_TARGET = 8 * 1024 * 1024        # live block bytes per grid step
    _VMEM_LIMIT = 64 * 1024 * 1024         # scoped VMEM limit we request
    _MIN_GRID_STEPS = 2                    # >= 2 stages for the DMA pipeline
else:                                      # v7x-class: 64 MiB VMEM, 2 TCs
    _BLOCK_TARGET = 4 * 1024 * 1024
    _VMEM_LIMIT = 32 * 1024 * 1024
    _MIN_GRID_STEPS = 4                    # >= 2 steps per TensorCore


# ------------------------------ tiling helpers --------------------------------

def _min_sublane(dtype):
    # minimum sublane tile: 8 for 32-bit, 16 for bf16/f16, 32 for int8/fp8
    return {4: 8, 2: 16, 1: 32}.get(jnp.dtype(dtype).itemsize, 8)


def _largest_divisor(n, cap, multiple_of=1):
    """Largest d with d | n, d <= cap and d % multiple_of == 0; 0 if none."""
    n = int(n)
    cap = min(int(cap), n)
    if cap <= 0 or multiple_of <= 0:
        return 0
    best = 0
    i = 1
    while i * i <= n:
        if n % i == 0:
            for d in (i, n // i):
                if d <= cap and d % multiple_of == 0 and d > best:
                    best = d
        i += 1
    return best


def _lane_tile(n, cap):
    """Lane (last-dim) tile: a multiple of 128 dividing n (<= cap), else n."""
    if n % 128 == 0:
        t = _largest_divisor(n, max(128, cap), multiple_of=128)
        if t:
            return t
    return n   # block lane dim == full array dim -> always legal


def _row_tile(rows, bytes_per_row, min_sub, target_bytes):
    """Second-minor tile: multiple of min_sub dividing rows (else a legal
    fallback), sized so one block stays near target_bytes."""
    cap = max(1, target_bytes // max(1, int(bytes_per_row)))
    t = _largest_divisor(rows, cap, multiple_of=min_sub)
    if t:
        return t
    return min_sub if rows % min_sub == 0 else rows


def _shrink_for_steps(tiles, dims, granules, min_steps):
    """Halve tiles (keeping divisibility + (8,128) legality via `granules`)
    until the grid has >= min_steps total steps, or nothing can shrink."""
    tiles = list(tiles)

    def total():
        s = 1
        for t, d in zip(tiles, dims):
            s *= d // t
        return s

    changed = True
    while total() < min_steps and changed:
        changed = False
        for i, g in enumerate(granules):
            if total() >= min_steps:
                break
            t = tiles[i]
            if t % (2 * g) == 0:          # halving keeps divisibility & granule
                tiles[i] = t // 2
                changed = True
    return tiles


def _params(grid):
    # All kernels here are independent per grid step (reductions are in-block),
    # so every axis is "parallel" -> megacore sharding on v7x, no-op elsewhere.
    return pltpu.CompilerParams(
        dimension_semantics=("parallel",) * len(grid),
        vmem_limit_bytes=_VMEM_LIMIT,
    )


# ------------------------------ Pallas kernels --------------------------------

def _sigmoid(x):
    # Single-transcendental sigmoid (one tanh EUP push per element instead of
    # exp + reciprocal) so these kernels stay HBM-bound even at v7x bandwidth.
    return 0.5 * jnp.tanh(0.5 * x) + 0.5


def relu_kernel(x_ref, o_ref):
    o_ref[...] = jnp.maximum(x_ref[...], 0.0)


def relu6_kernel(x_ref, o_ref):
    o_ref[...] = jnp.clip(x_ref[...], 0.0, 6.0)


def leaky_relu_kernel(slope, x_ref, o_ref):
    x = x_ref[...]
    o_ref[...] = jnp.where(x >= 0, x, slope * x)


def sigmoid_kernel(x_ref, o_ref):
    o_ref[...] = _sigmoid(x_ref[...])


def silu_kernel(x_ref, o_ref):
    x = x_ref[...]
    o_ref[...] = x * _sigmoid(x)


def tanh_kernel(x_ref, o_ref):
    o_ref[...] = jnp.tanh(x_ref[...])


def prelu_kernel(x_ref, w_ref, o_ref):
    # x_ref: (C, TQ) spatial tile of one image; w_ref: (C, 1) per-channel slope
    x = x_ref[...]
    w = w_ref[...]
    o_ref[...] = jnp.where(x >= 0, x, w * x)


def glu_kernel(a_ref, b_ref, o_ref):
    # GLU: first half * sigmoid(second half); a/b are two windows of the SAME
    # HBM buffer (no materialized half copies).
    o_ref[...] = a_ref[...] * _sigmoid(b_ref[...])


def softmax_lane_kernel(x_ref, o_ref, *, log):
    # softmax / log-softmax over the LAST (lane) axis of a (rows, D) block
    x = x_ref[...].astype(jnp.float32)
    m = jnp.max(x, axis=-1, keepdims=True)
    e = jnp.exp(x - m)
    s = jnp.sum(e, axis=-1, keepdims=True)
    if log:
        o_ref[...] = ((x - m) - jnp.log(s)).astype(o_ref.dtype)
    else:
        o_ref[...] = (e * pl.reciprocal(s)).astype(o_ref.dtype)   # exact recip


def softmax_mid_kernel(x_ref, o_ref, *, log):
    # softmax / log-softmax over axis 0 (the sublane axis) of a (D, TQ) block;
    # the trailing (lane) axis stays dense -> no transpose / moveaxis needed.
    x = x_ref[...].astype(jnp.float32)
    m = jnp.max(x, axis=0, keepdims=True)
    e = jnp.exp(x - m)
    s = jnp.sum(e, axis=0, keepdims=True)
    if log:
        o_ref[...] = ((x - m) - jnp.log(s)).astype(o_ref.dtype)
    else:
        o_ref[...] = (e * pl.reciprocal(s)).astype(o_ref.dtype)


# --------------------------- pallas_call wrappers ------------------------------

def _elementwise(kernel_fn, x):
    """Apply an elementwise kernel over a lane-dense, row-tiled 2-D view of x."""
    orig_shape = x.shape
    total = int(x.size)
    dtype = x.dtype
    itemsize = jnp.dtype(dtype).itemsize
    min_sub = _min_sublane(dtype)

    rows = lane = tr = 0
    if total % 128 == 0:
        # Prefer a lane width that still leaves enough rows for >=_MIN_GRID_STEPS
        # sublane-aligned row tiles (so both v7x TensorCores get work).
        lane_cap = _LANE_CAP
        want_rows = _MIN_GRID_STEPS * min_sub
        if total >= want_rows * 128 and total // _LANE_CAP < want_rows:
            lane_cap = max(128, total // want_rows)
        lane = _largest_divisor(total, lane_cap, multiple_of=128)
        rows = total // lane
        tr = _largest_divisor(rows, max(1, _BLOCK_TARGET // (2 * lane * itemsize)),
                              multiple_of=min_sub)
        if tr == 0 and rows * lane * itemsize <= _BLOCK_TARGET:
            tr = rows                      # small residue: one whole (small) block
    if tr == 0:
        # Non-128-aligned / awkwardly factored sizes: pad the flat view up to a
        # sublane-aligned (rows, 1024) grid so we still stream double-buffered,
        # lane-dense blocks (no giant single (1, total) block, no VMEM OOM).
        lane = 1024
        rows = -(-total // lane)
        rows = -(-rows // min_sub) * min_sub
        tr = _largest_divisor(rows, max(min_sub, _BLOCK_TARGET // (2 * lane * itemsize)),
                              multiple_of=min_sub) or min_sub

    (tr,) = _shrink_for_steps([tr], [rows], [min_sub], _MIN_GRID_STEPS)

    padded = rows * lane
    xf = x.reshape(-1)
    if padded != total:
        xf = jnp.pad(xf, (0, padded - total))
    x2 = xf.reshape(rows, lane)

    grid = (rows // tr,)
    out = pl.pallas_call(
        kernel_fn,
        out_shape=jax.ShapeDtypeStruct((rows, lane), dtype),
        grid=grid,
        in_specs=[pl.BlockSpec((tr, lane), lambda i: (i, 0))],
        out_specs=pl.BlockSpec((tr, lane), lambda i: (i, 0)),
        compiler_params=_params(grid),
    )(x2)
    if padded != total:
        return out.reshape(-1)[:total].reshape(orig_shape)
    return out.reshape(orig_shape)


def prelu_forward(x, w):
    # x: NCHW ; w: (C,) per-channel slope.  View x as (N, C, H*W) (free reshape),
    # grid over (image, spatial tile); w stays a tiny (1, C, 1) resident block.
    N, C, H, W = x.shape
    HW = H * W
    dtype = x.dtype
    itemsize = jnp.dtype(dtype).itemsize
    x3 = x.reshape(N, C, HW)
    w3 = w.reshape(1, C, 1).astype(dtype)

    tq = _lane_tile(HW, max(128, _BLOCK_TARGET // max(1, 2 * C * itemsize)))
    (tq,) = _shrink_for_steps([tq], [HW], [128],
                              max(1, -(-_MIN_GRID_STEPS // N)))
    grid = (N, HW // tq)
    out = pl.pallas_call(
        prelu_kernel,
        out_shape=jax.ShapeDtypeStruct((N, C, HW), dtype),
        grid=grid,
        in_specs=[
            pl.BlockSpec((None, C, tq), lambda n, q: (n, 0, q)),
            pl.BlockSpec((None, C, 1), lambda n, q: (0, 0, 0)),
        ],
        out_specs=pl.BlockSpec((None, C, tq), lambda n, q: (n, 0, q)),
        compiler_params=_params(grid),
    )(x3, w3)
    return out.reshape(x.shape)


def softmax_forward(x, dim, *, log=False):
    nd = x.ndim
    dim = dim % nd
    shape = x.shape
    dtype = x.dtype
    itemsize = jnp.dtype(dtype).itemsize
    min_sub = _min_sublane(dtype)
    # Per-element VMEM budget: in + out blocks in the native dtype plus ~3 f32
    # temporaries from the in-kernel f32 upcast (x, e, normalized out).
    bytes_per_elem = 2 * itemsize + 12

    if dim == nd - 1:
        # Reduction over the minor (lane) axis: (rows, D) view, tile rows.
        D = shape[-1]
        rows = int(x.size) // D
        x2 = x.reshape(rows, D)
        tr = _row_tile(rows, D * bytes_per_elem, min_sub, _BLOCK_TARGET)
        (tr,) = _shrink_for_steps([tr], [rows], [min_sub], _MIN_GRID_STEPS)
        grid = (rows // tr,)
        out = pl.pallas_call(
            functools.partial(softmax_lane_kernel, log=log),
            out_shape=jax.ShapeDtypeStruct((rows, D), dtype),
            grid=grid,
            in_specs=[pl.BlockSpec((tr, D), lambda i: (i, 0))],
            out_specs=pl.BlockSpec((tr, D), lambda i: (i, 0)),
            compiler_params=_params(grid),
        )(x2)
        return out.reshape(shape)

    # Reduction over a non-minor axis: (pre, D, post) view (free reshape, no
    # moveaxis copies); reduce over the sublane axis, keep `post` lane-dense.
    pre = 1
    for d in shape[:dim]:
        pre *= d
    D = shape[dim]
    post = 1
    for d in shape[dim + 1:]:
        post *= d
    x3 = x.reshape(pre, D, post)
    tq = _lane_tile(post, max(128, _BLOCK_TARGET // max(1, D * bytes_per_elem)))
    (tq,) = _shrink_for_steps([tq], [post], [128],
                              max(1, -(-_MIN_GRID_STEPS // pre)))
    grid = (pre, post // tq)
    out = pl.pallas_call(
        functools.partial(softmax_mid_kernel, log=log),
        out_shape=jax.ShapeDtypeStruct((pre, D, post), dtype),
        grid=grid,
        in_specs=[pl.BlockSpec((None, D, tq), lambda i, j: (i, 0, j))],
        out_specs=pl.BlockSpec((None, D, tq), lambda i, j: (i, 0, j)),
        compiler_params=_params(grid),
    )(x3)
    return out.reshape(shape)


def glu_forward(x, dim):
    nd = x.ndim
    dim = dim % nd
    shape = x.shape
    S = shape[dim]
    half = S // 2
    pre = 1
    for d in shape[:dim]:
        pre *= d
    post = 1
    for d in shape[dim + 1:]:
        post *= d
    hp = half * post
    out_full_shape = shape[:dim] + (half,) + shape[dim + 1:]
    dtype = x.dtype
    itemsize = jnp.dtype(dtype).itemsize
    min_sub = _min_sublane(dtype)

    # Free view: for each leading index, the first hp elements are the first
    # half along `dim`, the next hp the second half.  Both halves are addressed
    # through BlockSpec index offsets on this single HBM buffer -> one HBM read,
    # no materialized half-tensor copies, for aligned AND non-aligned shapes.
    x3 = x.reshape(pre, 2, hp)

    tq = _lane_tile(hp, _LANE_CAP)
    tp = _row_tile(pre, 3 * tq * itemsize, min_sub, _BLOCK_TARGET)
    tp, tq = _shrink_for_steps([tp, tq], [pre, hp], [min_sub, 128],
                               _MIN_GRID_STEPS)

    grid = (pre // tp, hp // tq)
    out = pl.pallas_call(
        glu_kernel,
        out_shape=jax.ShapeDtypeStruct((pre, hp), dtype),
        grid=grid,
        in_specs=[
            pl.BlockSpec((tp, None, tq), lambda i, j: (i, 0, j)),   # first half
            pl.BlockSpec((tp, None, tq), lambda i, j: (i, 1, j)),   # second half
        ],
        out_specs=pl.BlockSpec((tp, tq), lambda i, j: (i, j)),
        compiler_params=_params(grid),
    )(x3, x3)
    return out.reshape(out_full_shape)


# ----------------------------------- Act ---------------------------------------

class ActPallas:
    """Deterministic re-implementation of search_space.Act for NCHW inputs."""

    BASE_SPACE = ["LeakyReLU", "PReLU", "ReLU", "ReLU6", "Sigmoid", "SiLU",
                  "Tanh", "Softmax", "LogSoftmax"]

    def __init__(self, x_shape, layout="nchw", seed=0, dtype=jnp.float32, kind=None):
        rng = random.Random(seed)
        space = list(self.BASE_SPACE)
        if any(d % 2 == 0 for d in x_shape):      # Act.check()
            space.append("GLU")
        if layout == "nchw":
            space.append("Softmax2d")
        self.kind = kind if kind is not None else rng.choice(space)

        # the module's random scalar hyper-parameters (deterministic here)
        key = jax.random.PRNGKey(seed)
        k1, k2, k3 = jax.random.split(key, 3)
        self.all_ = float(jax.random.uniform(k1, ()) * 2.0 - 1.0) * MAX_VALUE
        self.left = float(jax.random.uniform(k2, ()) - 1.0) * MAX_VALUE   # unused
        self.right = float(jax.random.uniform(k3, ())) * MAX_VALUE        # unused

        self.dim = None
        self.weight = None
        if self.kind == "PReLU":
            # nn.PReLU(num_parameters=x.shape[1], init=all)
            self.weight = jnp.full((x_shape[1],), self.all_, dtype=dtype)
        elif self.kind in ("Softmax", "LogSoftmax"):
            self.dim = rng.choice(list(range(len(x_shape))))
        elif self.kind == "Softmax2d":
            self.dim = 1                           # softmax over channels
        elif self.kind == "GLU":
            even_vals = [d for d in x_shape if d % 2 == 0]
            val = rng.choice(even_vals)
            self.dim = list(x_shape).index(val)

    def __call__(self, x):
        k = self.kind
        if k == "ReLU":
            return _elementwise(relu_kernel, x)
        if k == "ReLU6":
            return _elementwise(relu6_kernel, x)
        if k == "LeakyReLU":
            return _elementwise(functools.partial(leaky_relu_kernel, self.all_), x)
        if k == "Sigmoid":
            return _elementwise(sigmoid_kernel, x)
        if k == "SiLU":
            return _elementwise(silu_kernel, x)
        if k == "Tanh":
            return _elementwise(tanh_kernel, x)
        if k == "PReLU":
            return prelu_forward(x, self.weight)
        if k in ("Softmax", "Softmax2d"):
            return softmax_forward(x, self.dim, log=False)
        if k == "LogSoftmax":
            return softmax_forward(x, self.dim, log=True)
        if k == "GLU":
            return glu_forward(x, self.dim)
        raise RuntimeError(f"unknown activation {k}")

    # pure-jnp reference for a correctness check
    def reference(self, x):
        k = self.kind
        if k == "ReLU":
            return jnp.maximum(x, 0.0)
        if k == "ReLU6":
            return jnp.clip(x, 0.0, 6.0)
        if k == "LeakyReLU":
            return jnp.where(x >= 0, x, self.all_ * x)
        if k == "Sigmoid":
            return jax.nn.sigmoid(x)
        if k == "SiLU":
            return x * jax.nn.sigmoid(x)
        if k == "Tanh":
            return jnp.tanh(x)
        if k == "PReLU":
            w = self.weight.reshape(1, -1, 1, 1)
            return jnp.where(x >= 0, x, w * x)
        if k in ("Softmax", "Softmax2d"):
            return jax.nn.softmax(x, axis=self.dim)
        if k == "LogSoftmax":
            return jax.nn.log_softmax(x, axis=self.dim)
        if k == "GLU":
            half = x.shape[self.dim] // 2
            a = jax.lax.slice_in_dim(x, 0, half, axis=self.dim)
            b = jax.lax.slice_in_dim(x, half, 2 * half, axis=self.dim)
            return a * jax.nn.sigmoid(b)
        raise RuntimeError(k)


# ----------------------------------- main ---------------------------------------

if __name__ == "__main__":
    # layout: NCHW, same axis convention as the PyTorch reference.
    key = jax.random.PRNGKey(0)
    k_main, k_odd = jax.random.split(key)
    x = jax.random.normal(k_main, (2, 4, 16, 16), dtype=jnp.float32)

    # Module-faithful path: one (seeded) random pick from the search space.
    act = ActPallas(x.shape, layout="nchw", seed=0)
    y = act(x)
    jax.block_until_ready(y)
    y_ref = act.reference(x)
    assert y.shape == y_ref.shape, (y.shape, y_ref.shape)
    assert jnp.allclose(y, y_ref, atol=1e-5, rtol=1e-5), \
        f"mismatch for {act.kind}: max err {float(jnp.max(jnp.abs(y - y_ref)))}"

    # Additionally exercise every member of the search space once (tiny shapes)
    # so all kernel paths are validated on-device.
    for forced_kind in ActPallas.BASE_SPACE + ["GLU", "Softmax2d"]:
        a = ActPallas(x.shape, layout="nchw", seed=0, kind=forced_kind)
        out = a(x)
        jax.block_until_ready(out)
        ref = a.reference(x)
        assert out.shape == ref.shape, (forced_kind, out.shape, ref.shape)
        err = float(jnp.max(jnp.abs(out - ref)))
        assert jnp.allclose(out, ref, atol=1e-5, rtol=1e-5), (forced_kind, err)

    # Exercise the padded (non-128-aligned) elementwise path as well.
    x_odd = jax.random.normal(k_odd, (3, 5, 7, 11), dtype=jnp.float32)
    y_odd = _elementwise(relu_kernel, x_odd)
    jax.block_until_ready(y_odd)
    assert jnp.allclose(y_odd, jnp.maximum(x_odd, 0.0), atol=1e-6)

    print("KERNEL_OK")
</pallas_src>

<mosaic_0001>
module attributes {stable_mosaic.version = 11 : i64} {
  func.func @tanh_kernel(%arg0: i32, %arg1: memref<1x2048xf32, #tpu.memory_space<vmem>>, %arg2: memref<1x2048xf32, #tpu.memory_space<vmem>>) attributes {dimension_semantics = [#tpu.dimension_semantics<parallel>], iteration_bounds = array<i64: 1>, scalar_prefetch = 0 : i64, scratch_operands = 0 : i64, tpu.core_type = #tpu.core_type<tc>, window_params = [{transform_indices = @transform_0, window_bounds = array<i64: 1, 2048>}, {transform_indices = @transform_1, window_bounds = array<i64: 1, 2048>}]} {
    %c0 = arith.constant 0 : index
    %c0_0 = arith.constant 0 : index
    %0 = vector.load %arg1[%c0, %c0_0] : memref<1x2048xf32, #tpu.memory_space<vmem>>, vector<1x2048xf32>
    %1 = math.tanh %0 : vector<1x2048xf32>
    %c0_1 = arith.constant 0 : index
    %c0_2 = arith.constant 0 : index
    %2 = vector.load %arg2[%c0_1, %c0_2] : memref<1x2048xf32, #tpu.memory_space<vmem>>, vector<1x2048xf32>
    tpu.vector_store %arg2[%c0_1, %c0_2], %1 {strides = array<i32>} : memref<1x2048xf32, #tpu.memory_space<vmem>>, vector<1x2048xf32>,
    return
  }
  func.func @transform_0(%arg0: i32) -> (i32, i32) {
    %c0_i32 = arith.constant 0 : i32
    %c0_i32_0 = arith.constant 0 : i32
    return %arg0, %c0_i32 : i32, i32
  }
  func.func @transform_1(%arg0: i32) -> (i32, i32) {
    %c0_i32 = arith.constant 0 : i32
    %c0_i32_0 = arith.constant 0 : i32
    return %arg0, %c0_i32 : i32, i32
  }
}

</mosaic_0001>

<bundles_post_ra>
// kernel: tpu_custom_call.1
= control target key start
LH: loop header
LB: loop body
LE: loop exit
PB: predicated region body
PF: predicated region fallthrough
CT: control target
= control target key end

     0   :  { %6 = vsyncpa [#allocation3], 0  ;;  %s132_s0 = inlined_call_operand.hbm [shape: f32[1,2048], index: 0, kind: input, shape index: {}]   ;;  %s133_s1 = inlined_call_operand.hbm [shape: f32[1,2048], index: 1, kind: output, shape index: {}]  }
   0x1   :  { %7 = vsyncpa [#allocation4], 0  ;;  %s96_s6 = smov [#allocation2]   ;;  %s48_s10 = scalar_lea.hbm %s132_s0, 256 }
   0x2   :  { %s14_s7 = sshll.u32 %s96_s6, 4  ;;  %p49_p0 = scmp.ne.s32.totalorder %s132_s0, %s48_s10  ;;  %s15_s7 = int_to_ptr.vmem [resolvable:$true] %s14_s7 }
   0x3   :  { %p52_p1 = scmp.lt.u32.totalorder %s48_s10, %s132_s0 }
   0x5   :  { %p54_p2 = pnand %p52_p1, %p49_p0 }
   0x7   :  { %57 = shalt.err (!%p54_p2)
}
   0x8   :  { %s58_s15 = scalar_lea.vmem %s15_s7, 256  ;;  %p63_p4 = scmp.lt.s32.totalorder %s15_s7, %s15_s7 }
   0x9   :  { %p59_p3 = scmp.ne.s32.totalorder %s15_s7, %s58_s15  ;;  %p64_p5 = scmp.lt.s32.totalorder %s58_s15, %s58_s15 }
   0xb   :  { %p65_p6 = por %p64_p5, %p63_p4 }
   0xd   :  { %p66_p7 = pnand %p65_p6, %p59_p3 }
   0xf   :  { %69 = shalt.err (!%p66_p7)
}
  0x10   :  { %17 = dma.hbm_to_vmem [thread:$0]  %s132_s0, 256, %s15_s7, [#allocation3]  }
  0x11   :  { %92 = dma.done.wait [#allocation3], 256  }
  0x12   :  { %93 = vsyncadd [#allocation3], 4294967040  ;;  %v21_v0 = vld [vmem:[#allocation2] sm:$0xff]  ;;  %v22_v1 = vld [vmem:[#allocation2 + $0x8] sm:$0xff]  ;;  %s97_s18 = smov [#allocation5]  }
  0x13   :  { %44 = vtanh.f32 %v21_v0  ;;  %s33_s19 = sshll.u32 %s97_s18, 4  ;;  %s34_s19 = int_to_ptr.vmem [resolvable:$true] %s33_s19 }
  0x14   :  { %46 = vtanh.f32 %v22_v1  ;;  %s70_s20 = scalar_lea.vmem %s34_s19, 256  ;;  %p75_p9 = scmp.lt.s32.totalorder %s34_s19, %s34_s19 }
  0x15   :  { %p71_p8 = scmp.ne.s32.totalorder %s34_s19, %s70_s20  ;;  %p76_p10 = scmp.lt.s32.totalorder %s70_s20, %s70_s20 }
  0x17   :  { %p77_p11 = por %p76_p10, %p75_p9 }
  0x19   :  { %p78_p12 = pnand %p77_p11, %p71_p8 }
  0x1d   :  { %v45_v2 = vpop.eup %44 }
  0x1e   :  { %v47_v3 = vpop.eup %46  ;;  %25 = vst [vmem:[#allocation5] sm:$0xff] %v45_v2 }
  0x1f   :  { %26 = vst [vmem:[#allocation5 + $0x8] sm:$0xff] %v47_v3 }
  0x20   :  { %81 = shalt.err (!%p78_p12)
}
  0x21   :  { %s82_s22 = scalar_lea.hbm %s133_s1, 256 }
  0x22   :  { %p83_p13 = scmp.ne.s32.totalorder %s133_s1, %s82_s22  ;;  %p86_p0 = scmp.lt.u32.totalorder %s82_s22, %s133_s1 }
  0x24   :  { %p88_p1 = pnand %p86_p0, %p83_p13 }
  0x26   :  { %91 = shalt.err (!%p88_p1)
}
  0x27   :  { %36 = dma.vmem_to_hbm [thread:$0]  %s34_s19, 256, %s133_s1, [#allocation4]  }
  0x28   :  { %94 = dma.done.wait [#allocation4], 256  }
  0x29   :  { %95 = vsyncadd [#allocation4], 4294967040 }
  0x2a   :  { %40 = vsyncpa [#allocation3], 1 }
  0x2b   :  { %41 = vsyncpa [#allocation4], 1 }

</bundles_post_ra>
